<compile_context>
chip_gen: v6e
topology: v6e:2x2x1
jax: 0.10.0
libtpu: 0.0.40
codegen_flags: <defaults>
</compile_context>

<pallas_src>
import functools

import jax
import jax.numpy as jnp
from jax.experimental import pallas as pl
from jax.experimental.pallas import tpu as pltpu

EPS = 1e-5


def _round_up(n, m):
    return ((n + m - 1) // m) * m


def _pad_to(arr, shape):
    pads = [(0, t - s) for s, t in zip(arr.shape, shape)]
    return jnp.pad(arr, pads)


def _mxu_lane_multiple():
    """256 on v6e/v7x (2x256x256 MXU: a 128-wide tail wastes half a pass),
    128 on v5e and older (128-native MXU)."""
    try:
        kind = jax.devices()[0].device_kind.lower()
    except Exception:
        return 128
    for old in ("v2", "v3", "v4", "v5"):
        if old in kind:
            return 128
    return 256


def _vmem_cap_bytes():
    """Generation-aware scoped-VMEM ceiling: ~48 MiB on v7x (64 MiB physical),
    ~96-100 MiB on v5e/v6e (128 MiB physical)."""
    try:
        phys = int(pltpu.get_tpu_info().vmem_capacity_bytes)
    except Exception:
        phys = 64 * 1024 * 1024
    return min(int(0.75 * phys), 100 * 1024 * 1024)


def _projector_kernel(x_ref, w1_hbm, w2_hbm, w3_hbm, w4_hbm, p_ref, o_ref,
                      wb1, wb2, wb3, wb4, sem):
    """x_ref: [B, E_pad] f32 (VMEM).  w*_hbm: padded weights left in HBM.
    p_ref rows: 0:g1 1:be1 2:g2 3:be2 4:g3 5:be3 6:b4 7:zeros (f32, VMEM).
    wb1..wb4: VMEM scratch for the weights (matmul dtype). sem: DMA sems [4]."""
    B = x_ref.shape[0]
    mm = wb1.dtype                      # matmul / inter-layer activation dtype
    inv_b = 1.0 / B
    ones_row = jnp.ones((1, B), jnp.float32)

    # Issue all weight DMAs immediately; only wait right before each layer so
    # w2..w4 loads overlap earlier-layer compute.
    cps = [pltpu.make_async_copy(w1_hbm, wb1, sem.at[0]),
           pltpu.make_async_copy(w2_hbm, wb2, sem.at[1]),
           pltpu.make_async_copy(w3_hbm, wb3, sem.at[2]),
           pltpu.make_async_copy(w4_hbm, wb4, sem.at[3])]
    for cp in cps:
        cp.start()

    def linear(h, w_ref):
        # Bias-free matmul (b1..b3 cancelled by train-mode BN); f32 accumulate.
        return jnp.dot(h, w_ref[...], preferred_element_type=jnp.float32)

    def bn_relu(h, g_row, be_row):
        # Single-pass batch stats via MXU column sums (frees the XLU); f32 math.
        s1 = jnp.dot(ones_row, h, preferred_element_type=jnp.float32)      # [1,D]
        s2 = jnp.dot(ones_row, h * h, preferred_element_type=jnp.float32)  # [1,D]
        mean = s1 * inv_b
        # Guard against catastrophic cancellation making var slightly negative.
        var = jnp.maximum(s2 * inv_b - mean * mean, 0.0)
        scale = g_row * jax.lax.rsqrt(var + EPS)
        shift = be_row - mean * scale
        # Carry the activation in the matmul dtype (bf16 by default) between
        # layers; padded feature lanes stay exactly zero (zero W cols + zero
        # gamma/beta), so padding never leaks into real lanes.
        return jnp.maximum(h * scale + shift, 0.0).astype(mm)

    x = x_ref[...].astype(mm)

    cps[0].wait()
    h = bn_relu(linear(x, wb1), p_ref[0:1, :], p_ref[1:2, :])
    cps[1].wait()
    h = bn_relu(linear(h, wb2), p_ref[2:3, :], p_ref[3:4, :])
    cps[2].wait()
    h = bn_relu(linear(h, wb3), p_ref[4:5, :], p_ref[5:6, :])
    cps[3].wait()
    o_ref[...] = (linear(h, wb4) + p_ref[6:7, :]).astype(o_ref.dtype)


def prepare_projector_params(params, *, matmul_dtype=jnp.bfloat16,
                             lane_multiple=None):
    """Pad + cast the weights ONCE, outside the training step (avoids rewriting
    all weight bytes through HBM on every forward call). Returns (prep, d_out).
    """
    if lane_multiple is None:
        lane_multiple = _mxu_lane_multiple()
    E = params["w1"].shape[0]
    D = params["w4"].shape[1]
    E_pad = _round_up(E, lane_multiple)
    D_pad = _round_up(D, lane_multiple)

    prep = {
        "w1": _pad_to(params["w1"], (E_pad, D_pad)).astype(matmul_dtype),
        "w2": _pad_to(params["w2"], (D_pad, D_pad)).astype(matmul_dtype),
        "w3": _pad_to(params["w3"], (D_pad, D_pad)).astype(matmul_dtype),
        "w4": _pad_to(params["w4"], (D_pad, D_pad)).astype(matmul_dtype),
    }
    # Pack all remaining small [1, D] parameter rows into a single f32 input.
    rows = [params["g1"], params["be1"], params["g2"], params["be2"],
            params["g3"], params["be3"], params["b4"],
            jnp.zeros((1, D), jnp.float32)]
    prep["pvec"] = _pad_to(jnp.concatenate(rows, axis=0), (8, D_pad))
    return prep, D


@functools.partial(jax.jit, static_argnames=("d_out",))
def projector_forward(x, prep, *, d_out):
    """x: [B, encoder_dim] f32 -> [B, d_out] f32 (training-mode BN)."""
    B, E = x.shape
    w1, w2, w3, w4, pvec = prep["w1"], prep["w2"], prep["w3"], prep["w4"], prep["pvec"]
    E_pad, D_pad = w1.shape

    # Lane-pad the input only; never pad the batch dim (would corrupt the
    # 1/B batch statistics). Keep B a multiple of 8 (16 for bf16) at the
    # caller for sublane-dense tiles.
    xp = _pad_to(x, (B, E_pad))

    itemsize = jnp.dtype(w1.dtype).itemsize
    need = (B * E_pad * 4                               # x
            + (E_pad + 3 * D_pad) * D_pad * itemsize    # weight VMEM scratch
            + 8 * D_pad * 4                             # packed rows
            + B * D_pad * 4                             # output
            + 4 * B * D_pad * 4)                        # live activation temps
    vmem_limit = max(min(int(1.5 * need), _vmem_cap_bytes()), 4 * 1024 * 1024)

    out_pad = pl.pallas_call(
        _projector_kernel,
        out_shape=jax.ShapeDtypeStruct((B, D_pad), jnp.float32),
        in_specs=[pl.BlockSpec(memory_space=pltpu.MemorySpace.VMEM),  # x
                  pl.BlockSpec(memory_space=pl.ANY),                  # w1 (HBM)
                  pl.BlockSpec(memory_space=pl.ANY),                  # w2 (HBM)
                  pl.BlockSpec(memory_space=pl.ANY),                  # w3 (HBM)
                  pl.BlockSpec(memory_space=pl.ANY),                  # w4 (HBM)
                  pl.BlockSpec(memory_space=pltpu.MemorySpace.VMEM)], # pvec
        out_specs=pl.BlockSpec(memory_space=pltpu.MemorySpace.VMEM),
        scratch_shapes=[pltpu.VMEM((E_pad, D_pad), w1.dtype),
                        pltpu.VMEM((D_pad, D_pad), w2.dtype),
                        pltpu.VMEM((D_pad, D_pad), w3.dtype),
                        pltpu.VMEM((D_pad, D_pad), w4.dtype),
                        pltpu.SemaphoreType.DMA((4,))],
        compiler_params=pltpu.CompilerParams(vmem_limit_bytes=vmem_limit),
    )(xp, w1, w2, w3, w4, pvec)

    return out_pad[:, :d_out]


def init_projector_params(key, encoder_dim, projector_dim):
    """Mirrors the PyTorch module's parameter shapes / default init.

    Linear: uniform(-1/sqrt(fan_in), 1/sqrt(fan_in)) for W and b, stored as
    [in, out]. BatchNorm: gamma=1, beta=0. (b1..b3 are kept here so the
    reference is PyTorch-faithful; the kernel provably does not need them.)
    """
    params = {}
    dims = [
        (encoder_dim, projector_dim),
        (projector_dim, projector_dim),
        (projector_dim, projector_dim),
        (projector_dim, projector_dim),
    ]
    keys = jax.random.split(key, 8)
    for i, (d_in, d_out) in enumerate(dims, start=1):
        bound = 1.0 / jnp.sqrt(jnp.float32(d_in))
        kw, kb = keys[2 * (i - 1)], keys[2 * (i - 1) + 1]
        params[f"w{i}"] = jax.random.uniform(
            kw, (d_in, d_out), jnp.float32, minval=-bound, maxval=bound)
        params[f"b{i}"] = jax.random.uniform(
            kb, (1, d_out), jnp.float32, minval=-bound, maxval=bound)
        if i <= 3:  # BN after the first three linears only
            params[f"g{i}"] = jnp.ones((1, d_out), jnp.float32)
            params[f"be{i}"] = jnp.zeros((1, d_out), jnp.float32)
    return params


def _reference_forward(x, params):
    """Pure-JAX, PyTorch-faithful reference (biases kept, two-pass variance)."""
    def bn_relu(h, g, be):
        mean = jnp.mean(h, axis=0, keepdims=True)
        var = jnp.mean((h - mean) ** 2, axis=0, keepdims=True)
        return jnp.maximum((h - mean) / jnp.sqrt(var + EPS) * g + be, 0.0)

    h = x
    h = bn_relu(h @ params["w1"] + params["b1"], params["g1"], params["be1"])
    h = bn_relu(h @ params["w2"] + params["b2"], params["g2"], params["be2"])
    h = bn_relu(h @ params["w3"] + params["b3"], params["g3"], params["be3"])
    return h @ params["w4"] + params["b4"]


if __name__ == "__main__":
    key = jax.random.PRNGKey(0)
    k_x, k_p = jax.random.split(key)

    batch = 16
    encoder_dim = 32
    projector_dim = 64

    x = jax.random.normal(k_x, (batch, encoder_dim), jnp.float32)
    params = init_projector_params(k_p, encoder_dim, projector_dim)
    ref = _reference_forward(x, params)

    # Default path: bf16 matmul operands + bf16 inter-layer activations,
    # f32 accumulation / BN math. Loose sanity check.
    prep_bf16, d_out = prepare_projector_params(params)  # bf16 by default
    out_bf16 = jax.block_until_ready(projector_forward(x, prep_bf16, d_out=d_out))
    assert out_bf16.shape == (batch, projector_dim)
    assert jnp.allclose(out_bf16, ref, atol=1e-1, rtol=1e-1), "bf16 mismatch vs reference"

    # f32 matmul path: tight numeric check against the PyTorch-faithful reference.
    prep_f32, _ = prepare_projector_params(params, matmul_dtype=jnp.float32)
    out_f32 = jax.block_until_ready(projector_forward(x, prep_f32, d_out=d_out))
    assert out_f32.shape == (batch, projector_dim)
    assert jnp.allclose(out_f32, ref, atol=2e-3, rtol=2e-3), "f32 mismatch vs reference"

    print("KERNEL_OK")
</pallas_src>

<mosaic_0001>
module attributes {stable_mosaic.version = 11 : i64} {
  func.func @_projector_kernel(%arg0: memref<16x256xf32, #tpu.memory_space<vmem>>, %arg1: memref<256x256xbf16, #tpu.memory_space<any>>, %arg2: memref<256x256xbf16, #tpu.memory_space<any>>, %arg3: memref<256x256xbf16, #tpu.memory_space<any>>, %arg4: memref<256x256xbf16, #tpu.memory_space<any>>, %arg5: memref<8x256xf32, #tpu.memory_space<vmem>>, %arg6: memref<16x256xf32, #tpu.memory_space<vmem>>, %arg7: memref<256x256xbf16, #tpu.memory_space<vmem>>, %arg8: memref<256x256xbf16, #tpu.memory_space<vmem>>, %arg9: memref<256x256xbf16, #tpu.memory_space<vmem>>, %arg10: memref<256x256xbf16, #tpu.memory_space<vmem>>, %arg11: memref<4x!tpu.dma_semaphore, #tpu.memory_space<semaphore_mem>>) attributes {dimension_semantics = [], scalar_prefetch = 0 : i64, scratch_operands = 5 : i64, tpu.core_type = #tpu.core_type<tc>} {
    %cst = arith.constant 1.000000e+00 : f32
    %0 = vector.broadcast %cst : f32 to vector<1x16xf32>
    %c0_i32 = arith.constant 0 : i32
    %1 = tpu.memref_slice %arg11[%c0_i32] : memref<4x!tpu.dma_semaphore, #tpu.memory_space<semaphore_mem>> -> memref<1x!tpu.dma_semaphore, #tpu.memory_space<semaphore_mem>>
    %2 = tpu.memref_squeeze %1 : memref<1x!tpu.dma_semaphore, #tpu.memory_space<semaphore_mem>> -> memref<!tpu.dma_semaphore, #tpu.memory_space<semaphore_mem>>
    tpu.enqueue_dma source(%arg1 : memref<256x256xbf16, #tpu.memory_space<any>>) target(%arg7 : memref<256x256xbf16, #tpu.memory_space<vmem>>) target_semaphore(%2 : memref<!tpu.dma_semaphore, #tpu.memory_space<semaphore_mem>>)
    %c1_i32 = arith.constant 1 : i32
    %3 = tpu.memref_slice %arg11[%c1_i32] : memref<4x!tpu.dma_semaphore, #tpu.memory_space<semaphore_mem>> -> memref<1x!tpu.dma_semaphore, #tpu.memory_space<semaphore_mem>>
    %4 = tpu.memref_squeeze %3 : memref<1x!tpu.dma_semaphore, #tpu.memory_space<semaphore_mem>> -> memref<!tpu.dma_semaphore, #tpu.memory_space<semaphore_mem>>
    tpu.enqueue_dma source(%arg2 : memref<256x256xbf16, #tpu.memory_space<any>>) target(%arg8 : memref<256x256xbf16, #tpu.memory_space<vmem>>) target_semaphore(%4 : memref<!tpu.dma_semaphore, #tpu.memory_space<semaphore_mem>>)
    %c2_i32 = arith.constant 2 : i32
    %5 = tpu.memref_slice %arg11[%c2_i32] : memref<4x!tpu.dma_semaphore, #tpu.memory_space<semaphore_mem>> -> memref<1x!tpu.dma_semaphore, #tpu.memory_space<semaphore_mem>>
    %6 = tpu.memref_squeeze %5 : memref<1x!tpu.dma_semaphore, #tpu.memory_space<semaphore_mem>> -> memref<!tpu.dma_semaphore, #tpu.memory_space<semaphore_mem>>
    tpu.enqueue_dma source(%arg3 : memref<256x256xbf16, #tpu.memory_space<any>>) target(%arg9 : memref<256x256xbf16, #tpu.memory_space<vmem>>) target_semaphore(%6 : memref<!tpu.dma_semaphore, #tpu.memory_space<semaphore_mem>>)
    %c3_i32 = arith.constant 3 : i32
    %7 = tpu.memref_slice %arg11[%c3_i32] : memref<4x!tpu.dma_semaphore, #tpu.memory_space<semaphore_mem>> -> memref<1x!tpu.dma_semaphore, #tpu.memory_space<semaphore_mem>>
    %8 = tpu.memref_squeeze %7 : memref<1x!tpu.dma_semaphore, #tpu.memory_space<semaphore_mem>> -> memref<!tpu.dma_semaphore, #tpu.memory_space<semaphore_mem>>
    tpu.enqueue_dma source(%arg4 : memref<256x256xbf16, #tpu.memory_space<any>>) target(%arg10 : memref<256x256xbf16, #tpu.memory_space<vmem>>) target_semaphore(%8 : memref<!tpu.dma_semaphore, #tpu.memory_space<semaphore_mem>>)
    %c0 = arith.constant 0 : index
    %c0_0 = arith.constant 0 : index
    %9 = vector.load %arg0[%c0, %c0_0] : memref<16x256xf32, #tpu.memory_space<vmem>>, vector<16x256xf32>
    %10 = arith.truncf %9 : vector<16x256xf32> to vector<16x256xbf16>
    %c0_i32_1 = arith.constant 0 : i32
    %11 = tpu.memref_slice %arg11[%c0_i32_1] : memref<4x!tpu.dma_semaphore, #tpu.memory_space<semaphore_mem>> -> memref<1x!tpu.dma_semaphore, #tpu.memory_space<semaphore_mem>>
    %12 = tpu.memref_squeeze %11 : memref<1x!tpu.dma_semaphore, #tpu.memory_space<semaphore_mem>> -> memref<!tpu.dma_semaphore, #tpu.memory_space<semaphore_mem>>
    tpu.wait_dma2 semaphore(%12 : memref<!tpu.dma_semaphore, #tpu.memory_space<semaphore_mem>>) src(%arg1 : memref<256x256xbf16, #tpu.memory_space<any>>) dst(%arg7 : memref<256x256xbf16, #tpu.memory_space<vmem>>)
    %c0_2 = arith.constant 0 : index
    %c0_3 = arith.constant 0 : index
    %13 = vector.load %arg7[%c0_2, %c0_3] : memref<256x256xbf16, #tpu.memory_space<vmem>>, vector<256x256xbf16>
    %cst_4 = arith.constant dense<0.000000e+00> : vector<16x256xf32>
    %14 = tpu.matmul %10, %13, %cst_4 {dimension_numbers = #tpu.dot_dimension_numbers<[1], [0], [0], [1], [0, 0, 1, 1], [], []>} : vector<16x256xbf16>, vector<256x256xbf16>, vector<16x256xf32> -> vector<16x256xf32>
    %c0_5 = arith.constant 0 : index
    %c0_6 = arith.constant 0 : index
    %15 = vector.load %arg5[%c0_5, %c0_6] : memref<8x256xf32, #tpu.memory_space<vmem>>, vector<1x256xf32>
    %c1 = arith.constant 1 : index
    %c0_7 = arith.constant 0 : index
    %16 = vector.load %arg5[%c1, %c0_7] : memref<8x256xf32, #tpu.memory_space<vmem>>, vector<1x256xf32>
    %cst_8 = arith.constant dense<0.000000e+00> : vector<1x256xf32>
    %17 = tpu.matmul %0, %14, %cst_8 {dimension_numbers = #tpu.dot_dimension_numbers<[1], [0], [0], [1], [0, 0, 1, 1], [], []>} : vector<1x16xf32>, vector<16x256xf32>, vector<1x256xf32> -> vector<1x256xf32>
    %18 = arith.mulf %14, %14 : vector<16x256xf32>
    %cst_9 = arith.constant dense<0.000000e+00> : vector<1x256xf32>
    %19 = tpu.matmul %0, %18, %cst_9 {dimension_numbers = #tpu.dot_dimension_numbers<[1], [0], [0], [1], [0, 0, 1, 1], [], []>} : vector<1x16xf32>, vector<16x256xf32>, vector<1x256xf32> -> vector<1x256xf32>
    %cst_10 = arith.constant 6.250000e-02 : f32
    %20 = vector.broadcast %cst_10 : f32 to vector<1x256xf32>
    %21 = arith.mulf %17, %20 : vector<1x256xf32>
    %cst_11 = arith.constant 6.250000e-02 : f32
    %22 = vector.broadcast %cst_11 : f32 to vector<1x256xf32>
    %23 = arith.mulf %19, %22 : vector<1x256xf32>
    %24 = arith.mulf %21, %21 : vector<1x256xf32>
    %25 = arith.subf %23, %24 : vector<1x256xf32>
    %cst_12 = arith.constant 0.000000e+00 : f32
    %26 = vector.broadcast %cst_12 : f32 to vector<1x256xf32>
    %27 = arith.maximumf %25, %26 : vector<1x256xf32>
    %cst_13 = arith.constant 9.99999974E-6 : f32
    %28 = vector.broadcast %cst_13 : f32 to vector<1x256xf32>
    %29 = arith.addf %27, %28 : vector<1x256xf32>
    %30 = math.rsqrt %29 : vector<1x256xf32>
    %31 = arith.mulf %15, %30 : vector<1x256xf32>
    %32 = arith.mulf %21, %31 : vector<1x256xf32>
    %33 = arith.subf %16, %32 : vector<1x256xf32>
    %34 = vector.broadcast %31 : vector<1x256xf32> to vector<16x256xf32>
    %35 = arith.mulf %14, %34 : vector<16x256xf32>
    %36 = vector.broadcast %33 : vector<1x256xf32> to vector<16x256xf32>
    %37 = arith.addf %35, %36 : vector<16x256xf32>
    %cst_14 = arith.constant 0.000000e+00 : f32
    %38 = vector.broadcast %cst_14 : f32 to vector<16x256xf32>
    %39 = arith.maximumf %37, %38 : vector<16x256xf32>
    %40 = arith.truncf %39 : vector<16x256xf32> to vector<16x256xbf16>
    %c1_i32_15 = arith.constant 1 : i32
    %41 = tpu.memref_slice %arg11[%c1_i32_15] : memref<4x!tpu.dma_semaphore, #tpu.memory_space<semaphore_mem>> -> memref<1x!tpu.dma_semaphore, #tpu.memory_space<semaphore_mem>>
    %42 = tpu.memref_squeeze %41 : memref<1x!tpu.dma_semaphore, #tpu.memory_space<semaphore_mem>> -> memref<!tpu.dma_semaphore, #tpu.memory_space<semaphore_mem>>
    tpu.wait_dma2 semaphore(%42 : memref<!tpu.dma_semaphore, #tpu.memory_space<semaphore_mem>>) src(%arg2 : memref<256x256xbf16, #tpu.memory_space<any>>) dst(%arg8 : memref<256x256xbf16, #tpu.memory_space<vmem>>)
    %c0_16 = arith.constant 0 : index
    %c0_17 = arith.constant 0 : index
    %43 = vector.load %arg8[%c0_16, %c0_17] : memref<256x256xbf16, #tpu.memory_space<vmem>>, vector<256x256xbf16>
    %cst_18 = arith.constant dense<0.000000e+00> : vector<16x256xf32>
    %44 = tpu.matmul %40, %43, %cst_18 {dimension_numbers = #tpu.dot_dimension_numbers<[1], [0], [0], [1], [0, 0, 1, 1], [], []>} : vector<16x256xbf16>, vector<256x256xbf16>, vector<16x256xf32> -> vector<16x256xf32>
    %c2 = arith.constant 2 : index
    %c0_19 = arith.constant 0 : index
    %45 = vector.load %arg5[%c2, %c0_19] : memref<8x256xf32, #tpu.memory_space<vmem>>, vector<1x256xf32>
    %c3 = arith.constant 3 : index
    %c0_20 = arith.constant 0 : index
    %46 = vector.load %arg5[%c3, %c0_20] : memref<8x256xf32, #tpu.memory_space<vmem>>, vector<1x256xf32>
    %cst_21 = arith.constant dense<0.000000e+00> : vector<1x256xf32>
    %47 = tpu.matmul %0, %44, %cst_21 {dimension_numbers = #tpu.dot_dimension_numbers<[1], [0], [0], [1], [0, 0, 1, 1], [], []>} : vector<1x16xf32>, vector<16x256xf32>, vector<1x256xf32> -> vector<1x256xf32>
    %48 = arith.mulf %44, %44 : vector<16x256xf32>
    %cst_22 = arith.constant dense<0.000000e+00> : vector<1x256xf32>
    %49 = tpu.matmul %0, %48, %cst_22 {dimension_numbers = #tpu.dot_dimension_numbers<[1], [0], [0], [1], [0, 0, 1, 1], [], []>} : vector<1x16xf32>, vector<16x256xf32>, vector<1x256xf32> -> vector<1x256xf32>
    %cst_23 = arith.constant 6.250000e-02 : f32
    %50 = vector.broadcast %cst_23 : f32 to vector<1x256xf32>
    %51 = arith.mulf %47, %50 : vector<1x256xf32>
    %cst_24 = arith.constant 6.250000e-02 : f32
    %52 = vector.broadcast %cst_24 : f32 to vector<1x256xf32>
    %53 = arith.mulf %49, %52 : vector<1x256xf32>
    %54 = arith.mulf %51, %51 : vector<1x256xf32>
    %55 = arith.subf %53, %54 : vector<1x256xf32>
    %cst_25 = arith.constant 0.000000e+00 : f32
    %56 = vector.broadcast %cst_25 : f32 to vector<1x256xf32>
    %57 = arith.maximumf %55, %56 : vector<1x256xf32>
    %cst_26 = arith.constant 9.99999974E-6 : f32
    %58 = vector.broadcast %cst_26 : f32 to vector<1x256xf32>
    %59 = arith.addf %57, %58 : vector<1x256xf32>
    %60 = math.rsqrt %59 : vector<1x256xf32>
    %61 = arith.mulf %45, %60 : vector<1x256xf32>
    %62 = arith.mulf %51, %61 : vector<1x256xf32>
    %63 = arith.subf %46, %62 : vector<1x256xf32>
    %64 = vector.broadcast %61 : vector<1x256xf32> to vector<16x256xf32>
    %65 = arith.mulf %44, %64 : vector<16x256xf32>
    %66 = vector.broadcast %63 : vector<1x256xf32> to vector<16x256xf32>
    %67 = arith.addf %65, %66 : vector<16x256xf32>
    %cst_27 = arith.constant 0.000000e+00 : f32
    %68 = vector.broadcast %cst_27 : f32 to vector<16x256xf32>
    %69 = arith.maximumf %67, %68 : vector<16x256xf32>
    %70 = arith.truncf %69 : vector<16x256xf32> to vector<16x256xbf16>
    %c2_i32_28 = arith.constant 2 : i32
    %71 = tpu.memref_slice %arg11[%c2_i32_28] : memref<4x!tpu.dma_semaphore, #tpu.memory_space<semaphore_mem>> -> memref<1x!tpu.dma_semaphore, #tpu.memory_space<semaphore_mem>>
    %72 = tpu.memref_squeeze %71 : memref<1x!tpu.dma_semaphore, #tpu.memory_space<semaphore_mem>> -> memref<!tpu.dma_semaphore, #tpu.memory_space<semaphore_mem>>
    tpu.wait_dma2 semaphore(%72 : memref<!tpu.dma_semaphore, #tpu.memory_space<semaphore_mem>>) src(%arg3 : memref<256x256xbf16, #tpu.memory_space<any>>) dst(%arg9 : memref<256x256xbf16, #tpu.memory_space<vmem>>)
    %c0_29 = arith.constant 0 : index
    %c0_30 = arith.constant 0 : index
    %73 = vector.load %arg9[%c0_29, %c0_30] : memref<256x256xbf16, #tpu.memory_space<vmem>>, vector<256x256xbf16>
    %cst_31 = arith.constant dense<0.000000e+00> : vector<16x256xf32>
    %74 = tpu.matmul %70, %73, %cst_31 {dimension_numbers = #tpu.dot_dimension_numbers<[1], [0], [0], [1], [0, 0, 1, 1], [], []>} : vector<16x256xbf16>, vector<256x256xbf16>, vector<16x256xf32> -> vector<16x256xf32>
    %c4 = arith.constant 4 : index
    %c0_32 = arith.constant 0 : index
    %75 = vector.load %arg5[%c4, %c0_32] : memref<8x256xf32, #tpu.memory_space<vmem>>, vector<1x256xf32>
    %c5 = arith.constant 5 : index
    %c0_33 = arith.constant 0 : index
    %76 = vector.load %arg5[%c5, %c0_33] : memref<8x256xf32, #tpu.memory_space<vmem>>, vector<1x256xf32>
    %cst_34 = arith.constant dense<0.000000e+00> : vector<1x256xf32>
    %77 = tpu.matmul %0, %74, %cst_34 {dimension_numbers = #tpu.dot_dimension_numbers<[1], [0], [0], [1], [0, 0, 1, 1], [], []>} : vector<1x16xf32>, vector<16x256xf32>, vector<1x256xf32> -> vector<1x256xf32>
    %78 = arith.mulf %74, %74 : vector<16x256xf32>
    %cst_35 = arith.constant dense<0.000000e+00> : vector<1x256xf32>
    %79 = tpu.matmul %0, %78, %cst_35 {dimension_numbers = #tpu.dot_dimension_numbers<[1], [0], [0], [1], [0, 0, 1, 1], [], []>} : vector<1x16xf32>, vector<16x256xf32>, vector<1x256xf32> -> vector<1x256xf32>
    %cst_36 = arith.constant 6.250000e-02 : f32
    %80 = vector.broadcast %cst_36 : f32 to vector<1x256xf32>
    %81 = arith.mulf %77, %80 : vector<1x256xf32>
    %cst_37 = arith.constant 6.250000e-02 : f32
    %82 = vector.broadcast %cst_37 : f32 to vector<1x256xf32>
    %83 = arith.mulf %79, %82 : vector<1x256xf32>
    %84 = arith.mulf %81, %81 : vector<1x256xf32>
    %85 = arith.subf %83, %84 : vector<1x256xf32>
    %cst_38 = arith.constant 0.000000e+00 : f32
    %86 = vector.broadcast %cst_38 : f32 to vector<1x256xf32>
    %87 = arith.maximumf %85, %86 : vector<1x256xf32>
    %cst_39 = arith.constant 9.99999974E-6 : f32
    %88 = vector.broadcast %cst_39 : f32 to vector<1x256xf32>
    %89 = arith.addf %87, %88 : vector<1x256xf32>
    %90 = math.rsqrt %89 : vector<1x256xf32>
    %91 = arith.mulf %75, %90 : vector<1x256xf32>
    %92 = arith.mulf %81, %91 : vector<1x256xf32>
    %93 = arith.subf %76, %92 : vector<1x256xf32>
    %94 = vector.broadcast %91 : vector<1x256xf32> to vector<16x256xf32>
    %95 = arith.mulf %74, %94 : vector<16x256xf32>
    %96 = vector.broadcast %93 : vector<1x256xf32> to vector<16x256xf32>
    %97 = arith.addf %95, %96 : vector<16x256xf32>
    %cst_40 = arith.constant 0.000000e+00 : f32
    %98 = vector.broadcast %cst_40 : f32 to vector<16x256xf32>
    %99 = arith.maximumf %97, %98 : vector<16x256xf32>
    %100 = arith.truncf %99 : vector<16x256xf32> to vector<16x256xbf16>
    %c3_i32_41 = arith.constant 3 : i32
    %101 = tpu.memref_slice %arg11[%c3_i32_41] : memref<4x!tpu.dma_semaphore, #tpu.memory_space<semaphore_mem>> -> memref<1x!tpu.dma_semaphore, #tpu.memory_space<semaphore_mem>>
    %102 = tpu.memref_squeeze %101 : memref<1x!tpu.dma_semaphore, #tpu.memory_space<semaphore_mem>> -> memref<!tpu.dma_semaphore, #tpu.memory_space<semaphore_mem>>
    tpu.wait_dma2 semaphore(%102 : memref<!tpu.dma_semaphore, #tpu.memory_space<semaphore_mem>>) src(%arg4 : memref<256x256xbf16, #tpu.memory_space<any>>) dst(%arg10 : memref<256x256xbf16, #tpu.memory_space<vmem>>)
    %c0_42 = arith.constant 0 : index
    %c0_43 = arith.constant 0 : index
    %103 = vector.load %arg10[%c0_42, %c0_43] : memref<256x256xbf16, #tpu.memory_space<vmem>>, vector<256x256xbf16>
    %cst_44 = arith.constant dense<0.000000e+00> : vector<16x256xf32>
    %104 = tpu.matmul %100, %103, %cst_44 {dimension_numbers = #tpu.dot_dimension_numbers<[1], [0], [0], [1], [0, 0, 1, 1], [], []>} : vector<16x256xbf16>, vector<256x256xbf16>, vector<16x256xf32> -> vector<16x256xf32>
    %c6 = arith.constant 6 : index
    %c0_45 = arith.constant 0 : index
    %105 = vector.load %arg5[%c6, %c0_45] : memref<8x256xf32, #tpu.memory_space<vmem>>, vector<1x256xf32>
    %106 = vector.broadcast %105 : vector<1x256xf32> to vector<16x256xf32>
    %107 = arith.addf %104, %106 : vector<16x256xf32>
    %c0_46 = arith.constant 0 : index
    %c0_47 = arith.constant 0 : index
    %108 = vector.load %arg6[%c0_46, %c0_47] : memref<16x256xf32, #tpu.memory_space<vmem>>, vector<16x256xf32>
    tpu.vector_store %arg6[%c0_46, %c0_47], %107 {strides = array<i32>} : memref<16x256xf32, #tpu.memory_space<vmem>>, vector<16x256xf32>,
    return
  }
}

</mosaic_0001>

<bundles_post_ra>
// kernel: projector_forward.1
= control target key start
LH: loop header
LB: loop body
LE: loop exit
PB: predicated region body
PF: predicated region fallthrough
CT: control target
= control target key end

     0   :  { %s2232_s21 = smov [#allocation2]   ;;  %s2233_s23 = smov [#allocation3]   ;;  %s2423_s0 = inlined_call_operand.vmem [shape: f32[16,256], index: 0, kind: input, shape index: {}]   ;;  %s2424_s1 = inlined_call_operand.hbm [shape: bf16[256,256], index: 1, kind: input, shape index: {}]   ;;  %s2425_s5 = inlined_call_operand.vmem [shape: f32[8,256], index: 5, kind: input, shape index: {}]   ;;  %s2426_s6 = inlined_call_operand.vmem [shape: f32[16,256], index: 6, kind: output, shape index: {}]   ;;  %s2427_s2 = inlined_call_operand.hbm [shape: bf16[256,256], index: 2, kind: input, shape index: {}]   ;;  %s2428_s3 = inlined_call_operand.hbm [shape: bf16[256,256], index: 3, kind: input, shape index: {}]   ;;  %s2429_s4 = inlined_call_operand.hbm [shape: bf16[256,256], index: 4, kind: input, shape index: {}]  }
   0x1   :  { %s22_s22 = sshll.u32 %s2232_s21, 4  ;;  %s34_s24 = sshll.u32 %s2233_s23, 4  ;;  %v2277_v0 = vld [vmem:[%s2423_s0] sm:$0xff]  ;;  %v63_v1 = vld [vmem:[%s2423_s0 + $0x8] sm:$0xff]  ;;  %v2285_v2 = vld [vmem:[%s2423_s0 + $0x10] sm:$0xff]  ;;  %s23_s22 = int_to_ptr.vmem [resolvable:$true] %s22_s22  ;;  %s35_s24 = int_to_ptr.vmem [resolvable:$true] %s34_s24 }
   0x2   :  { %v65_v3 = vld [vmem:[%s2423_s0 + $0x18] sm:$0xff]  ;;  %v66_v4 = vpack.c.bf16 %v2285_v2, %v2277_v0  ;;  %s2152_s9 = scalar_lea.vmem %s23_s22, 4096  ;;  %p2157_p1 = scmp.lt.s32.totalorder %s23_s22, %s23_s22 }
   0x3   :  { %p2153_p0 = scmp.ne.s32.totalorder %s23_s22, %s2152_s9  ;;  %p2158_p2 = scmp.lt.s32.totalorder %s2152_s9, %s2152_s9 }
   0x5   :  { %p2159_p3 = por %p2158_p2, %p2157_p1 }
   0x7   :  { %p2160_p4 = pnand %p2159_p3, %p2153_p0 }
   0x9   :  { %2163 = shalt.err (!%p2160_p4)  }
   0xa   :  { %25 = dma.hbm_to_vmem [thread:$0]  %s2424_s1, 4096, %s23_s22, [#allocation6]  ;;  %v67_v5 = vpack.c.bf16 %v65_v3, %v63_v1 }
   0xb   :  { %s2172_s12 = scalar_lea.vmem %s35_s24, 4096  ;;  %p2177_p6 = scmp.lt.s32.totalorder %s35_s24, %s35_s24 }
   0xc   :  { %p2173_p5 = scmp.ne.s32.totalorder %s35_s24, %s2172_s12  ;;  %p2178_p7 = scmp.lt.s32.totalorder %s2172_s12, %s2172_s12 }
   0xe   :  { %p2179_p8 = por %p2178_p7, %p2177_p6 }
  0x10   :  { %p2180_p9 = pnand %p2179_p8, %p2173_p5 }
  0x12   :  { %2183 = shalt.err (!%p2180_p9)  }
  0x13   :  { %37 = dma.hbm_to_vmem [thread:$0]  %s2427_s2, 4096, %s35_s24, [#allocation6 + $0x1] }
  0x14   :  { %s2234_s14 = smov [#allocation4]   ;;  %s2235_s16 = smov [#allocation5]  }
  0x15   :  { %s46_s15 = sshll.u32 %s2234_s14, 4  ;;  %s58_s17 = sshll.u32 %s2235_s16, 4  ;;  %s47_s15 = int_to_ptr.vmem [resolvable:$true] %s46_s15  ;;  %s59_s17 = int_to_ptr.vmem [resolvable:$true] %s58_s17 }
  0x16   :  { %s2192_s18 = scalar_lea.vmem %s47_s15, 4096  ;;  %p2197_p11 = scmp.lt.s32.totalorder %s47_s15, %s47_s15 }
  0x17   :  { %p2193_p10 = scmp.ne.s32.totalorder %s47_s15, %s2192_s18  ;;  %p2198_p12 = scmp.lt.s32.totalorder %s2192_s18, %s2192_s18 }
  0x19   :  { %p2199_p13 = por %p2198_p12, %p2197_p11 }
  0x1b   :  { %p2200_p0 = pnand %p2199_p13, %p2193_p10 }
  0x1d   :  { %2203 = shalt.err (!%p2200_p0)  }
  0x1e   :  { %49 = dma.hbm_to_vmem [thread:$0]  %s2428_s3, 4096, %s47_s15, [#allocation6 + $0x2] }
  0x1f   :  { %s2212_s20 = scalar_lea.vmem %s59_s17, 4096  ;;  %p2217_p2 = scmp.lt.s32.totalorder %s59_s17, %s59_s17 }
  0x20   :  { %p2213_p1 = scmp.ne.s32.totalorder %s59_s17, %s2212_s20  ;;  %p2218_p3 = scmp.lt.s32.totalorder %s2212_s20, %s2212_s20 }
  0x22   :  { %p2219_p4 = por %p2218_p3, %p2217_p2 }
  0x24   :  { %p2220_p5 = pnand %p2219_p4, %p2213_p1 }
  0x26   :  { %2223 = shalt.err (!%p2220_p5)  }
  0x27   :  { %61 = dma.hbm_to_vmem [thread:$0]  %s2429_s4, 4096, %s59_s17, [#allocation6 + $0x3] }
  0x28   :  { %2224 = dma.done.wait [#allocation6], 4096 }
  0x29   :  { %2225 = vsyncadd [#allocation6], 4294963200  ;;  %296 = vmatprep.mubr.bf16.mxu0 %v67_v5  ;;  %v1940_v6 = vld [vmem:[#allocation2 + $0x74] ss:$8 sps:$4 sm:$0xff]   ;;  %v1942_v7 = vld [vmem:[#allocation2 + $0x70] ss:$8 sps:$4 sm:$0xff]   ;;  %v480_v2 = vlaneseq }
  0x2a   :  { %264 = vmatprep.subr.bf16.mxu0 %v1940_v6  ;;  %v1943_v8 = vld [vmem:[#allocation2 + $0x64] ss:$8 sps:$4 sm:$0xff]   ;;  %v1945_v9 = vld [vmem:[#allocation2 + $0x60] ss:$8 sps:$4 sm:$0xff]   ;;  %v1946_v10 = vld [vmem:[#allocation2 + $0x54] ss:$8 sps:$4 sm:$0xff]  }
  0x2b   :  { %265 = vmatpush1.bf16.msra.mxu0 %v1942_v7  ;;  %v1948_v11 = vld [vmem:[#allocation2 + $0x50] ss:$8 sps:$4 sm:$0xff]   ;;  %v1949_v12 = vld [vmem:[#allocation2 + $0x44] ss:$8 sps:$4 sm:$0xff]   ;;  %v1951_v13 = vld [vmem:[#allocation2 + $0x40] ss:$8 sps:$4 sm:$0xff]  }
  0x2c   :  { %266 = vmatprep.subr.bf16.mxu0 %v1943_v8  ;;  %v1952_v14 = vld [vmem:[#allocation2 + $0x34] ss:$8 sps:$4 sm:$0xff]   ;;  %v1954_v15 = vld [vmem:[#allocation2 + $0x30] ss:$8 sps:$4 sm:$0xff]   ;;  %v1955_v16 = vld [vmem:[#allocation2 + $0x24] ss:$8 sps:$4 sm:$0xff]  }
  0x2d   :  { %v1957_v17 = vld [vmem:[#allocation2 + $0x20] ss:$8 sps:$4 sm:$0xff]   ;;  %v1958_v18 = vld [vmem:[#allocation2 + $0x14] ss:$8 sps:$4 sm:$0xff]   ;;  %v1960_v19 = vld [vmem:[#allocation2 + $0x10] ss:$8 sps:$4 sm:$0xff]  }
  0x2e   :  { %v1961_v20 = vld [vmem:[#allocation2 + $0x4] ss:$8 sps:$4 sm:$0xff]   ;;  %v1963_v21 = vld [vmem:[#allocation2] ss:$8 sps:$4 sm:$0xff]   ;;  %v1964_v22 = vld [vmem:[#allocation2 + $0xf4] ss:$8 sps:$4 sm:$0xff]  }
  0x2f   :  { %267 = vmatpush1.bf16.msra.mxu0 %v1945_v9  ;;  %v1966_v23 = vld [vmem:[#allocation2 + $0xf0] ss:$8 sps:$4 sm:$0xff]   ;;  %v1967_v24 = vld [vmem:[#allocation2 + $0xe4] ss:$8 sps:$4 sm:$0xff]   ;;  %v1969_v25 = vld [vmem:[#allocation2 + $0xe0] ss:$8 sps:$4 sm:$0xff]  }
  0x30   :  { %268 = vmatprep.subr.bf16.mxu0 %v1946_v10  ;;  %v1970_v26 = vld [vmem:[#allocation2 + $0xd4] ss:$8 sps:$4 sm:$0xff]   ;;  %v1972_v27 = vld [vmem:[#allocation2 + $0xd0] ss:$8 sps:$4 sm:$0xff]   ;;  %v1973_v28 = vld [vmem:[#allocation2 + $0xc4] ss:$8 sps:$4 sm:$0xff]  }
  0x31   :  { %v1975_v29 = vld [vmem:[#allocation2 + $0xc0] ss:$8 sps:$4 sm:$0xff]   ;;  %v1976_v30 = vld [vmem:[#allocation2 + $0xb4] ss:$8 sps:$4 sm:$0xff]   ;;  %v1978_v31 = vld [vmem:[#allocation2 + $0xb0] ss:$8 sps:$4 sm:$0xff]  }
  0x32   :  { %v1979_v32 = vld [vmem:[#allocation2 + $0xa4] ss:$8 sps:$4 sm:$0xff]   ;;  %v1981_v33 = vld [vmem:[#allocation2 + $0xa0] ss:$8 sps:$4 sm:$0xff]   ;;  %v1982_v34 = vld [vmem:[#allocation2 + $0x94] ss:$8 sps:$4 sm:$0xff]  }
  0x33   :  { %269 = vmatpush1.bf16.msra.mxu0 %v1948_v11  ;;  %v1984_v35 = vld [vmem:[#allocation2 + $0x90] ss:$8 sps:$4 sm:$0xff]   ;;  %v1985_v36 = vld [vmem:[#allocation2 + $0x84] ss:$8 sps:$4 sm:$0xff]   ;;  %v1987_v37 = vld [vmem:[#allocation2 + $0x80] ss:$8 sps:$4 sm:$0xff]  }
  0x34   :  { %270 = vmatprep.subr.bf16.mxu0 %v1949_v12  ;;  %v2236_v38 = vmov 0.0   ;;  %vm310_vm0 = vcmask 130048   ;;  %v2237_v46 = vmov 1.0   ;;  %v2238_v0 = vmov 1966171168  }
  0x35   :  { %378 = vmatprep.mubr.f32.mxu1 %v2236_v38  ;;  %v478_v1 = vunpack.c.l.s4 %v2238_v0  ;;  %v307_v10 = vld [vmem:[%s2425_s5] ss:$8 sm:$0x3] }
  0x37   :  { %271 = vmatpush1.bf16.msra.mxu0 %v1951_v13  ;;  %v479_v3 = vunpack.c.0.s8 %v478_v1 }
  0x38   :  { %272 = vmatprep.subr.bf16.mxu0 %v1952_v14 }
  0x3b   :  { %273 = vmatpush1.bf16.msra.mxu0 %v1954_v15 }
  0x3c   :  { %274 = vmatprep.subr.bf16.mxu0 %v1955_v16 }
  0x3f   :  { %275 = vmatpush1.bf16.msra.mxu0 %v1957_v17 }
  0x40   :  { %276 = vmatprep.subr.bf16.mxu0 %v1958_v18 }
  0x43   :  { %277 = vmatpush1.bf16.msra.mxu0 %v1960_v19 }
  0x44   :  { %278 = vmatprep.subr.bf16.mxu0 %v1961_v20 }
  0x47   :  { %279 = vmatpush1.bf16.msra.mxu0 %v1963_v21  ;;  %v1821_v21 = vld [vmem:[%s2425_s5 + $0x1] ss:$8 sm:$0x3] }
  0x48   :  { %280 = vmatprep.subr.bf16.mxu0 %v1964_v22 }
  0x4b   :  { %281 = vmatpush2.bf16.msra.mxu0 %v1966_v23 }
  0x4c   :  { %282 = vmatprep.subr.bf16.mxu0 %v1967_v24 }
  0x4f   :  { %283 = vmatpush2.bf16.msra.mxu0 %v1969_v25 }
  0x50   :  { %284 = vmatprep.subr.bf16.mxu0 %v1970_v26 }
  0x53   :  { %285 = vmatpush2.bf16.msra.mxu0 %v1972_v27 }
  0x54   :  { %286 = vmatprep.subr.bf16.mxu0 %v1973_v28 }
  0x57   :  { %287 = vmatpush2.bf16.msra.mxu0 %v1975_v29 }
  0x58   :  { %288 = vmatprep.subr.bf16.mxu0 %v1976_v30 }
  0x5b   :  { %289 = vmatpush2.bf16.msra.mxu0 %v1978_v31 }
  0x5c   :  { %290 = vmatprep.subr.bf16.mxu0 %v1979_v32 }
  0x5f   :  { %291 = vmatpush2.bf16.msra.mxu0 %v1981_v33 }
  0x60   :  { %292 = vmatprep.subr.bf16.mxu0 %v1982_v34 }
  0x63   :  { %293 = vmatpush2.bf16.msra.mxu0 %v1984_v35 }
  0x64   :  { %294 = vmatprep.subr.bf16.mxu0 %v1985_v36 }
  0x67   :  { %295 = vmatpush2.bf16.msra.mxu0 %v1987_v37 }
  0x6a   :  { %297 = vmatmul.mubr.bf16.vlgmr.msra.gmra.mxu0 %v66_v4  ;;  %v481_v4 = vshrl.u32 %v480_v2, 7 }
  0x6c   :  { %v2333_v6 = vsub.s32 %v479_v3, %v481_v4  ;;  %v2340_v12 = vsub.s32 0, %v481_v4  ;;  %v2342_v13 = vsub.s32 1, %v481_v4 }
 0x12a   :  { %v2308_v39 = vpop.f32.mrf.mxu0 }
 0x12b   :  { %v385_v47 = vmul.f32 %v2308_v39, %v2308_v39 }
 0x12c   :  { %v2310_v40 = vpop.f32.mrf.mxu0 }
 0x12d   :  { %v386_v45 = vmul.f32 %v2310_v40, %v2310_v40 }
 0x12e   :  { %v2312_v41 = vpop.f32.mrf.mxu0 }
 0x12f   :  { %v387_v44 = vmul.f32 %v2312_v41, %v2312_v41 }
 0x130   :  { %v2314_v42 = vpop.f32.mrf.mxu0 }
 0x131   :  { %342 = vmatprep.subr.mxu1 %v2314_v42  ;;  %v388_v43 = vmul.f32 %v2314_v42, %v2314_v42 }
 0x132   :  { %343 = vmatpush1.msra.mxu1 %v2312_v41 }
 0x133   :  { %344 = vmatprep.subr.mxu1 %v2310_v40 }
 0x134   :  { %345 = vmatpush1.msra.mxu1 %v2308_v39 }
 0x135   :  { %1822 = vmatmul.mubr.msk.f32.vlgmr.msra.gmra.mxu1 %vm310_vm0, %v2237_v46  ;;  %417 = vmatprep.subr.mxu1 %v388_v43 }
 0x136   :  { %418 = vmatpush1.msra.mxu1 %v387_v44  ;;  %453 = vmatprep.mubr.f32.mxu1 %v2236_v38 }
 0x137   :  { %419 = vmatprep.subr.mxu1 %v386_v45 }
 0x138   :  { %420 = vmatpush1.msra.mxu1 %v385_v47 }
 0x139   :  { %1823 = vmatmul.mubr.msk.f32.vlgmr.msra.gmra.mxu1 %vm310_vm0, %v2237_v46 }
 0x1f5   :  { %v380_v48 = vpop.f32.mrf.mxu1 }
 0x1f6   :  { %v460_v49 = vmul.f32 0.0625, %v380_v48 }
 0x1f7   :  { %v382_v50 = vpop.f32.mrf.mxu1 }
 0x1f8   :  { %v461_v51 = vmul.f32 0.0625, %v382_v50  ;;  %v464_v53 = vmul.f32 %v460_v49, %v460_v49 }
 0x1f9   :  { %v455_v52 = vpop.f32.mrf.mxu1 }
 0x1fa   :  { %v462_v54 = vmul.f32 0.0625, %v455_v52  ;;  %v465_v56 = vmul.f32 %v461_v51, %v461_v51 }
 0x1fb   :  { %v457_v55 = vpop.f32.mrf.mxu1 }
 0x1fc   :  { %v466_v57 = vsub.f32 %v462_v54, %v464_v53  ;;  %v463_v58 = vmul.f32 0.0625, %v457_v55 }
 0x1fe   :  { %v468_v59 = vmax.f32 %v466_v57, 0.0  ;;  %v467_v60 = vsub.f32 %v463_v58, %v465_v56 }
 0x200   :  { %v470_v61 = vadd.f32 1e-05, %v468_v59  ;;  %v469_v62 = vmax.f32 %v467_v60, 0.0 }
 0x202   :  { %v471_v63 = vadd.f32 1e-05, %v469_v62  ;;  %1988 = vrsqrt.f32 %v470_v61 }
 0x204   :  { %1990 = vrsqrt.f32 %v471_v63 }
 0x20f   :  { %v1989_v5 = vpop.eup %1988 }
 0x211   :  { %v1991_v7 = vpop.eup %1990 }
 0x212   :  { %v476_v8 = vcombine.low %v1989_v5, %v1991_v7 }
 0x214   :  { %v483_v9 = vrot.slane %v476_v8, %v2333_v6 }
 0x216   :  { %v490_v11 = vrot.slane %v483_v9, %v2333_v6 }
 0x218   :  { %v492_v14 = vmul.f32 %v490_v11, %v307_v10 }
 0x21a   :  { %v497_v15 = vrot.slane %v492_v14, %v2340_v12  ;;  %v501_v16 = vrot.slane %v492_v14, %v2342_v13 }
 0x21c   :  { %v504_v17 = vmul.f32 %v497_v15, %v460_v49  ;;  %v505_v18 = vmul.f32 %v501_v16, %v461_v51  ;;  %v525_v24 = vmul.f32 %v497_v15, %v2308_v39  ;;  %v526_v25 = vmul.f32 %v501_v16, %v2310_v40 }
 0x21d   :  { %v527_v26 = vmul.f32 %v497_v15, %v2312_v41  ;;  %v528_v27 = vmul.f32 %v501_v16, %v2314_v42 }
 0x21e   :  { %v508_v19 = vcombine.low %v504_v17, %v505_v18 }
 0x220   :  { %v515_v20 = vrot.slane %v508_v19, %v2333_v6 }
 0x222   :  { %v522_v22 = vrot.slane %v515_v20, %v2333_v6 }
 0x224   :  { %v524_v23 = vsub.f32 %v1821_v21, %v522_v22 }
 0x226   :  { %v533_v28 = vrot.slane %v524_v23, %v2340_v12  ;;  %v537_v29 = vrot.slane %v524_v23, %v2342_v13 }
 0x228   :  { %v540_v30 = vadd.f32 %v533_v28, %v525_v24  ;;  %v541_v31 = vadd.f32 %v537_v29, %v526_v25  ;;  %v542_v32 = vadd.f32 %v533_v28, %v527_v26  ;;  %v543_v33 = vadd.f32 %v537_v29, %v528_v27 }
 0x22a   :  { %v544_v34 = vmax.f32 %v540_v30, 0.0  ;;  %v545_v35 = vmax.f32 %v541_v31, 0.0  ;;  %v546_v36 = vmax.f32 %v542_v32, 0.0  ;;  %v547_v37 = vmax.f32 %v543_v33, 0.0 }
 0x22c   :  { %v2357_v43 = vpack.c.bf16 %v546_v36, %v544_v34  ;;  %v549_v39 = vpack.c.bf16 %v547_v37, %v545_v35 }
 0x22d   :  { %2226 = dma.done.wait [#allocation6 + $0x1], 4096 }
 0x22e   :  { %2227 = vsyncadd [#allocation6 + $0x1], 4294963200  ;;  %776 = vmatprep.mubr.bf16.mxu1 %v549_v39  ;;  %930 = vmatprep.mubr.f32.mxu0 %v2236_v38  ;;  %v1992_v40 = vld [vmem:[#allocation3 + $0x74] ss:$8 sps:$4 sm:$0xff]   ;;  %v1994_v41 = vld [vmem:[#allocation3 + $0x70] ss:$8 sps:$4 sm:$0xff]  }
 0x22f   :  { %744 = vmatprep.subr.bf16.mxu1 %v1992_v40  ;;  %v1995_v42 = vld [vmem:[#allocation3 + $0x64] ss:$8 sps:$4 sm:$0xff]   ;;  %v1997_v44 = vld [vmem:[#allocation3 + $0x60] ss:$8 sps:$4 sm:$0xff]   ;;  %v1998_v45 = vld [vmem:[#allocation3 + $0x54] ss:$8 sps:$4 sm:$0xff]  }
 0x230   :  { %745 = vmatpush1.bf16.msra.mxu1 %v1994_v41  ;;  %v2000_v47 = vld [vmem:[#allocation3 + $0x50] ss:$8 sps:$4 sm:$0xff]   ;;  %v2001_v48 = vld [vmem:[#allocation3 + $0x44] ss:$8 sps:$4 sm:$0xff]   ;;  %v2003_v49 = vld [vmem:[#allocation3 + $0x40] ss:$8 sps:$4 sm:$0xff]  }
 0x231   :  { %746 = vmatprep.subr.bf16.mxu1 %v1995_v42  ;;  %v2004_v50 = vld [vmem:[#allocation3 + $0x34] ss:$8 sps:$4 sm:$0xff]   ;;  %v2006_v51 = vld [vmem:[#allocation3 + $0x30] ss:$8 sps:$4 sm:$0xff]   ;;  %v2007_v52 = vld [vmem:[#allocation3 + $0x24] ss:$8 sps:$4 sm:$0xff]  }
 0x232   :  { %v2009_v53 = vld [vmem:[#allocation3 + $0x20] ss:$8 sps:$4 sm:$0xff]   ;;  %v2010_v54 = vld [vmem:[#allocation3 + $0x14] ss:$8 sps:$4 sm:$0xff]   ;;  %v2012_v55 = vld [vmem:[#allocation3 + $0x10] ss:$8 sps:$4 sm:$0xff]  }
 0x233   :  { %v2013_v56 = vld [vmem:[#allocation3 + $0x4] ss:$8 sps:$4 sm:$0xff]   ;;  %v2015_v57 = vld [vmem:[#allocation3] ss:$8 sps:$4 sm:$0xff]   ;;  %v2016_v58 = vld [vmem:[#allocation3 + $0xf4] ss:$8 sps:$4 sm:$0xff]  }
 0x234   :  { %747 = vmatpush1.bf16.msra.mxu1 %v1997_v44  ;;  %v2018_v59 = vld [vmem:[#allocation3 + $0xf0] ss:$8 sps:$4 sm:$0xff]   ;;  %v2019_v60 = vld [vmem:[#allocation3 + $0xe4] ss:$8 sps:$4 sm:$0xff]   ;;  %v2021_v61 = vld [vmem:[#allocation3 + $0xe0] ss:$8 sps:$4 sm:$0xff]  }
 0x235   :  { %748 = vmatprep.subr.bf16.mxu1 %v1998_v45  ;;  %v2022_v62 = vld [vmem:[#allocation3 + $0xd4] ss:$8 sps:$4 sm:$0xff]   ;;  %v2024_v63 = vld [vmem:[#allocation3 + $0xd0] ss:$8 sps:$4 sm:$0xff]   ;;  %v2025_v0 = vld [vmem:[#allocation3 + $0xc4] ss:$8 sps:$4 sm:$0xff]  }
 0x236   :  { %v2027_v1 = vld [vmem:[#allocation3 + $0xc0] ss:$8 sps:$4 sm:$0xff]   ;;  %v2028_v2 = vld [vmem:[#allocation3 + $0xb4] ss:$8 sps:$4 sm:$0xff]   ;;  %v2030_v3 = vld [vmem:[#allocation3 + $0xb0] ss:$8 sps:$4 sm:$0xff]  }
 0x237   :  { %v2031_v4 = vld [vmem:[#allocation3 + $0xa4] ss:$8 sps:$4 sm:$0xff]   ;;  %v2033_v5 = vld [vmem:[#allocation3 + $0xa0] ss:$8 sps:$4 sm:$0xff]   ;;  %v2034_v7 = vld [vmem:[#allocation3 + $0x94] ss:$8 sps:$4 sm:$0xff]  }
 0x238   :  { %749 = vmatpush1.bf16.msra.mxu1 %v2000_v47  ;;  %v2036_v8 = vld [vmem:[#allocation3 + $0x90] ss:$8 sps:$4 sm:$0xff]   ;;  %v2037_v9 = vld [vmem:[#allocation3 + $0x84] ss:$8 sps:$4 sm:$0xff]   ;;  %v2039_v10 = vld [vmem:[#allocation3 + $0x80] ss:$8 sps:$4 sm:$0xff]  }
 0x239   :  { %750 = vmatprep.subr.bf16.mxu1 %v2001_v48  ;;  %v1856_v41 = vld [vmem:[%s2425_s5 + $0x2] ss:$8 sm:$0x3] }
 0x23c   :  { %751 = vmatpush1.bf16.msra.mxu1 %v2003_v49 }
 0x23d   :  { %752 = vmatprep.subr.bf16.mxu1 %v2004_v50 }
 0x240   :  { %753 = vmatpush1.bf16.msra.mxu1 %v2006_v51 }
 0x241   :  { %754 = vmatprep.subr.bf16.mxu1 %v2007_v52  ;;  %v1857_v52 = vld [vmem:[%s2425_s5 + $0x3] ss:$8 sm:$0x3] }
 0x244   :  { %755 = vmatpush1.bf16.msra.mxu1 %v2009_v53 }
 0x245   :  { %756 = vmatprep.subr.bf16.mxu1 %v2010_v54 }
 0x248   :  { %757 = vmatpush1.bf16.msra.mxu1 %v2012_v55 }
 0x249   :  { %758 = vmatprep.subr.bf16.mxu1 %v2013_v56 }
 0x24c   :  { %759 = vmatpush1.bf16.msra.mxu1 %v2015_v57 }
 0x24d   :  { %760 = vmatprep.subr.bf16.mxu1 %v2016_v58 }
 0x250   :  { %761 = vmatpush2.bf16.msra.mxu1 %v2018_v59 }
 0x251   :  { %762 = vmatprep.subr.bf16.mxu1 %v2019_v60 }
 0x254   :  { %763 = vmatpush2.bf16.msra.mxu1 %v2021_v61 }
 0x255   :  { %764 = vmatprep.subr.bf16.mxu1 %v2022_v62 }
 0x258   :  { %765 = vmatpush2.bf16.msra.mxu1 %v2024_v63 }
 0x259   :  { %766 = vmatprep.subr.bf16.mxu1 %v2025_v0 }
 0x25c   :  { %767 = vmatpush2.bf16.msra.mxu1 %v2027_v1 }
 0x25d   :  { %768 = vmatprep.subr.bf16.mxu1 %v2028_v2 }
 0x260   :  { %769 = vmatpush2.bf16.msra.mxu1 %v2030_v3 }
 0x261   :  { %770 = vmatprep.subr.bf16.mxu1 %v2031_v4 }
 0x264   :  { %771 = vmatpush2.bf16.msra.mxu1 %v2033_v5 }
 0x265   :  { %772 = vmatprep.subr.bf16.mxu1 %v2034_v7 }
 0x268   :  { %773 = vmatpush2.bf16.msra.mxu1 %v2036_v8 }
 0x269   :  { %774 = vmatprep.subr.bf16.mxu1 %v2037_v9 }
 0x26c   :  { %775 = vmatpush2.bf16.msra.mxu1 %v2039_v10 }
 0x26f   :  { %777 = vmatmul.mubr.bf16.vlgmr.msra.gmra.mxu1 %v2357_v43 }
 0x270   :  { %855 = vmatprep.mubr.f32.mxu1 %v2236_v38 }
 0x32f   :  { %v778_v11 = vpop.f32.mrf.mxu1 }
 0x330   :  { %v862_v20 = vmul.f32 %v778_v11, %v778_v11 }
 0x331   :  { %v780_v14 = vpop.f32.mrf.mxu1 }
 0x332   :  { %v863_v19 = vmul.f32 %v780_v14, %v780_v14 }
 0x333   :  { %v782_v15 = vpop.f32.mrf.mxu1 }
 0x334   :  { %v864_v18 = vmul.f32 %v782_v15, %v782_v15 }
 0x335   :  { %v784_v16 = vpop.f32.mrf.mxu1 }
 0x336   :  { %819 = vmatprep.subr.mxu1 %v784_v16  ;;  %v865_v17 = vmul.f32 %v784_v16, %v784_v16 }
 0x337   :  { %820 = vmatpush1.msra.mxu1 %v782_v15 }
 0x338   :  { %821 = vmatprep.subr.mxu1 %v780_v14  ;;  %894 = vmatprep.subr.mxu0 %v865_v17 }
 0x339   :  { %822 = vmatpush1.msra.mxu1 %v778_v11  ;;  %895 = vmatpush1.msra.mxu0 %v864_v18 }
 0x33a   :  { %1858 = vmatmul.mubr.msk.f32.vlgmr.msra.gmra.mxu1 %vm310_vm0, %v2237_v46  ;;  %896 = vmatprep.subr.mxu0 %v863_v19 }
 0x33b   :  { %897 = vmatpush1.msra.mxu0 %v862_v20 }
 0x33c   :  { %1859 = vmatmul.mubr.msk.f32.vlgmr.msra.gmra.mxu0 %vm310_vm0, %v2237_v46 }
 0x3fa   :  { %v857_v21 = vpop.f32.mrf.mxu1 }
 0x3fb   :  { %v937_v22 = vmul.f32 0.0625, %v857_v21 }
 0x3fc   :  { %v859_v23 = vpop.f32.mrf.mxu1  ;;  %v932_v24 = vpop.f32.mrf.mxu0 }
 0x3fd   :  { %v941_v25 = vmul.f32 %v937_v22, %v937_v22  ;;  %v938_v26 = vmul.f32 0.0625, %v859_v23  ;;  %v939_v27 = vmul.f32 0.0625, %v932_v24 }
 0x3fe   :  { %v934_v28 = vpop.f32.mrf.mxu0 }
 0x3ff   :  { %v942_v29 = vmul.f32 %v938_v26, %v938_v26  ;;  %v943_v30 = vsub.f32 %v939_v27, %v941_v25  ;;  %v940_v31 = vmul.f32 0.0625, %v934_v28 }
 0x401   :  { %v945_v32 = vmax.f32 %v943_v30, 0.0  ;;  %v944_v33 = vsub.f32 %v940_v31, %v942_v29 }
 0x403   :  { %v947_v34 = vadd.f32 1e-05, %v945_v32  ;;  %v946_v35 = vmax.f32 %v944_v33, 0.0 }
 0x405   :  { %v948_v36 = vadd.f32 1e-05, %v946_v35  ;;  %2040 = vrsqrt.f32 %v947_v34 }
 0x407   :  { %2042 = vrsqrt.f32 %v948_v36 }
 0x412   :  { %v2041_v37 = vpop.eup %2040 }
 0x414   :  { %v2043_v43 = vpop.eup %2042 }
 0x415   :  { %v953_v39 = vcombine.low %v2041_v37, %v2043_v43 }
 0x417   :  { %v960_v40 = vrot.slane %v953_v39, %v2333_v6 }
 0x419   :  { %v967_v42 = vrot.slane %v960_v40, %v2333_v6 }
 0x41b   :  { %v969_v44 = vmul.f32 %v1856_v41, %v967_v42 }
 0x41d   :  { %v974_v45 = vrot.slane %v969_v44, %v2340_v12  ;;  %v978_v47 = vrot.slane %v969_v44, %v2342_v13 }
 0x41f   :  { %v981_v48 = vmul.f32 %v974_v45, %v937_v22  ;;  %v982_v49 = vmul.f32 %v978_v47, %v938_v26  ;;  %v1002_v55 = vmul.f32 %v974_v45, %v778_v11  ;;  %v1003_v56 = vmul.f32 %v978_v47, %v780_v14 }
 0x420   :  { %v1004_v57 = vmul.f32 %v974_v45, %v782_v15  ;;  %v1005_v58 = vmul.f32 %v978_v47, %v784_v16 }
 0x421   :  { %v985_v50 = vcombine.low %v981_v48, %v982_v49 }
 0x423   :  { %v992_v51 = vrot.slane %v985_v50, %v2333_v6 }
 0x425   :  { %v999_v53 = vrot.slane %v992_v51, %v2333_v6 }
 0x427   :  { %v1001_v54 = vsub.f32 %v1857_v52, %v999_v53 }
 0x429   :  { %v1010_v59 = vrot.slane %v1001_v54, %v2340_v12  ;;  %v1014_v60 = vrot.slane %v1001_v54, %v2342_v13 }
 0x42b   :  { %v1017_v61 = vadd.f32 %v1010_v59, %v1002_v55  ;;  %v1018_v62 = vadd.f32 %v1014_v60, %v1003_v56  ;;  %v1019_v63 = vadd.f32 %v1010_v59, %v1004_v57  ;;  %v1020_v0 = vadd.f32 %v1014_v60, %v1005_v58 }
 0x42d   :  { %v1021_v1 = vmax.f32 %v1017_v61, 0.0  ;;  %v1022_v2 = vmax.f32 %v1018_v62, 0.0  ;;  %v1023_v3 = vmax.f32 %v1019_v63, 0.0  ;;  %v1024_v4 = vmax.f32 %v1020_v0, 0.0 }
 0x42f   :  { %v2380_v5 = vpack.c.bf16 %v1023_v3, %v1021_v1  ;;  %v1026_v7 = vpack.c.bf16 %v1024_v4, %v1022_v2 }
 0x430   :  { %2228 = dma.done.wait [#allocation6 + $0x2], 4096 }
 0x431   :  { %2229 = vsyncadd [#allocation6 + $0x2], 4294963200  ;;  %1253 = vmatprep.mubr.bf16.mxu1 %v1026_v7  ;;  %1332 = vmatprep.mubr.f32.mxu0 %v2236_v38  ;;  %v2044_v8 = vld [vmem:[#allocation4 + $0x74] ss:$8 sps:$4 sm:$0xff]   ;;  %v2046_v9 = vld [vmem:[#allocation4 + $0x70] ss:$8 sps:$4 sm:$0xff]  }
 0x432   :  { %1221 = vmatprep.subr.bf16.mxu1 %v2044_v8  ;;  %v2047_v10 = vld [vmem:[#allocation4 + $0x64] ss:$8 sps:$4 sm:$0xff]   ;;  %v2049_v11 = vld [vmem:[#allocation4 + $0x60] ss:$8 sps:$4 sm:$0xff]   ;;  %v2050_v14 = vld [vmem:[#allocation4 + $0x54] ss:$8 sps:$4 sm:$0xff]  }
 0x433   :  { %1222 = vmatpush1.bf16.msra.mxu1 %v2046_v9  ;;  %v2052_v15 = vld [vmem:[#allocation4 + $0x50] ss:$8 sps:$4 sm:$0xff]   ;;  %v2053_v16 = vld [vmem:[#allocation4 + $0x44] ss:$8 sps:$4 sm:$0xff]   ;;  %v2055_v17 = vld [vmem:[#allocation4 + $0x40] ss:$8 sps:$4 sm:$0xff]  }
 0x434   :  { %1223 = vmatprep.subr.bf16.mxu1 %v2047_v10  ;;  %v2056_v18 = vld [vmem:[#allocation4 + $0x34] ss:$8 sps:$4 sm:$0xff]   ;;  %v2058_v19 = vld [vmem:[#allocation4 + $0x30] ss:$8 sps:$4 sm:$0xff]   ;;  %v2059_v20 = vld [vmem:[#allocation4 + $0x24] ss:$8 sps:$4 sm:$0xff]  }
 0x435   :  { %v2061_v21 = vld [vmem:[#allocation4 + $0x20] ss:$8 sps:$4 sm:$0xff]   ;;  %v2062_v22 = vld [vmem:[#allocation4 + $0x14] ss:$8 sps:$4 sm:$0xff]   ;;  %v2064_v23 = vld [vmem:[#allocation4 + $0x10] ss:$8 sps:$4 sm:$0xff]  }
 0x436   :  { %v2065_v24 = vld [vmem:[#allocation4 + $0x4] ss:$8 sps:$4 sm:$0xff]   ;;  %v2067_v25 = vld [vmem:[#allocation4] ss:$8 sps:$4 sm:$0xff]   ;;  %v2068_v26 = vld [vmem:[#allocation4 + $0xf4] ss:$8 sps:$4 sm:$0xff]  }
 0x437   :  { %1224 = vmatpush1.bf16.msra.mxu1 %v2049_v11  ;;  %v2070_v27 = vld [vmem:[#allocation4 + $0xf0] ss:$8 sps:$4 sm:$0xff]   ;;  %v2071_v28 = vld [vmem:[#allocation4 + $0xe4] ss:$8 sps:$4 sm:$0xff]   ;;  %v2073_v29 = vld [vmem:[#allocation4 + $0xe0] ss:$8 sps:$4 sm:$0xff]  }
 0x438   :  { %1225 = vmatprep.subr.bf16.mxu1 %v2050_v14  ;;  %v2074_v30 = vld [vmem:[#allocation4 + $0xd4] ss:$8 sps:$4 sm:$0xff]   ;;  %v2076_v31 = vld [vmem:[#allocation4 + $0xd0] ss:$8 sps:$4 sm:$0xff]   ;;  %v2077_v32 = vld [vmem:[#allocation4 + $0xc4] ss:$8 sps:$4 sm:$0xff]  }
 0x439   :  { %v2079_v33 = vld [vmem:[#allocation4 + $0xc0] ss:$8 sps:$4 sm:$0xff]   ;;  %v2080_v34 = vld [vmem:[#allocation4 + $0xb4] ss:$8 sps:$4 sm:$0xff]   ;;  %v2082_v35 = vld [vmem:[#allocation4 + $0xb0] ss:$8 sps:$4 sm:$0xff]  }
 0x43a   :  { %v2083_v36 = vld [vmem:[#allocation4 + $0xa4] ss:$8 sps:$4 sm:$0xff]   ;;  %v2085_v37 = vld [vmem:[#allocation4 + $0xa0] ss:$8 sps:$4 sm:$0xff]   ;;  %v2086_v43 = vld [vmem:[#allocation4 + $0x94] ss:$8 sps:$4 sm:$0xff]  }
 0x43b   :  { %1226 = vmatpush1.bf16.msra.mxu1 %v2052_v15  ;;  %v2088_v39 = vld [vmem:[#allocation4 + $0x90] ss:$8 sps:$4 sm:$0xff]   ;;  %v2089_v40 = vld [vmem:[#allocation4 + $0x84] ss:$8 sps:$4 sm:$0xff]   ;;  %v2091_v41 = vld [vmem:[#allocation4 + $0x80] ss:$8 sps:$4 sm:$0xff]  }
 0x43c   :  { %1227 = vmatprep.subr.bf16.mxu1 %v2053_v16  ;;  %v1892_v7 = vld [vmem:[%s2425_s5 + $0x4] ss:$8 sm:$0x3] }
 0x43f   :  { %1228 = vmatpush1.bf16.msra.mxu1 %v2055_v17 }
 0x440   :  { %1229 = vmatprep.subr.bf16.mxu1 %v2056_v18  ;;  %v1893_v18 = vld [vmem:[%s2425_s5 + $0x5] ss:$8 sm:$0x3] }
 0x443   :  { %1230 = vmatpush1.bf16.msra.mxu1 %v2058_v19 }
 0x444   :  { %1231 = vmatprep.subr.bf16.mxu1 %v2059_v20 }
 0x447   :  { %1232 = vmatpush1.bf16.msra.mxu1 %v2061_v21 }
 0x448   :  { %1233 = vmatprep.subr.bf16.mxu1 %v2062_v22 }
 0x44b   :  { %1234 = vmatpush1.bf16.msra.mxu1 %v2064_v23 }
 0x44c   :  { %1235 = vmatprep.subr.bf16.mxu1 %v2065_v24 }
 0x44f   :  { %1236 = vmatpush1.bf16.msra.mxu1 %v2067_v25 }
 0x450   :  { %1237 = vmatprep.subr.bf16.mxu1 %v2068_v26 }
 0x453   :  { %1238 = vmatpush2.bf16.msra.mxu1 %v2070_v27 }
 0x454   :  { %1239 = vmatprep.subr.bf16.mxu1 %v2071_v28 }
 0x457   :  { %1240 = vmatpush2.bf16.msra.mxu1 %v2073_v29 }
 0x458   :  { %1241 = vmatprep.subr.bf16.mxu1 %v2074_v30 }
 0x45b   :  { %1242 = vmatpush2.bf16.msra.mxu1 %v2076_v31 }
 0x45c   :  { %1243 = vmatprep.subr.bf16.mxu1 %v2077_v32 }
 0x45f   :  { %1244 = vmatpush2.bf16.msra.mxu1 %v2079_v33 }
 0x460   :  { %1245 = vmatprep.subr.bf16.mxu1 %v2080_v34 }
 0x463   :  { %1246 = vmatpush2.bf16.msra.mxu1 %v2082_v35 }
 0x464   :  { %1247 = vmatprep.subr.bf16.mxu1 %v2083_v36 }
 0x467   :  { %1248 = vmatpush2.bf16.msra.mxu1 %v2085_v37 }
 0x468   :  { %1249 = vmatprep.subr.bf16.mxu1 %v2086_v43 }
 0x46b   :  { %1250 = vmatpush2.bf16.msra.mxu1 %v2088_v39 }
 0x46c   :  { %1251 = vmatprep.subr.bf16.mxu1 %v2089_v40 }
 0x46f   :  { %1252 = vmatpush2.bf16.msra.mxu1 %v2091_v41 }
 0x472   :  { %1254 = vmatmul.mubr.bf16.vlgmr.msra.gmra.mxu1 %v2380_v5 }
 0x532   :  { %v1255_v42 = vpop.f32.mrf.mxu1 }
 0x533   :  { %v1339_v51 = vmul.f32 %v1255_v42, %v1255_v42 }
 0x534   :  { %v1257_v44 = vpop.f32.mrf.mxu1 }
 0x535   :  { %v1340_v50 = vmul.f32 %v1257_v44, %v1257_v44 }
 0x536   :  { %v1259_v45 = vpop.f32.mrf.mxu1 }
 0x537   :  { %v1341_v49 = vmul.f32 %v1259_v45, %v1259_v45 }
 0x538   :  { %v1261_v47 = vpop.f32.mrf.mxu1 }
 0x539   :  { %1296 = vmatprep.subr.mxu0 %v1261_v47  ;;  %v1342_v48 = vmul.f32 %v1261_v47, %v1261_v47 }
 0x53a   :  { %1297 = vmatpush1.msra.mxu0 %v1259_v45 }
 0x53b   :  { %1298 = vmatprep.subr.mxu0 %v1257_v44 }
 0x53c   :  { %1299 = vmatpush1.msra.mxu0 %v1255_v42 }
 0x53d   :  { %1894 = vmatmul.mubr.msk.f32.vlgmr.msra.gmra.mxu0 %vm310_vm0, %v2237_v46  ;;  %1371 = vmatprep.subr.mxu0 %v1342_v48 }
 0x53e   :  { %1372 = vmatpush1.msra.mxu0 %v1341_v49  ;;  %1407 = vmatprep.mubr.f32.mxu0 %v2236_v38 }
 0x53f   :  { %1373 = vmatprep.subr.mxu0 %v1340_v50 }
 0x540   :  { %1374 = vmatpush1.msra.mxu0 %v1339_v51 }
 0x541   :  { %1895 = vmatmul.mubr.msk.f32.vlgmr.msra.gmra.mxu0 %vm310_vm0, %v2237_v46 }
 0x5fd   :  { %v1334_v52 = vpop.f32.mrf.mxu0 }
 0x5fe   :  { %v1414_v53 = vmul.f32 0.0625, %v1334_v52 }
 0x5ff   :  { %v1336_v54 = vpop.f32.mrf.mxu0 }
 0x600   :  { %v1415_v55 = vmul.f32 0.0625, %v1336_v54  ;;  %v1418_v57 = vmul.f32 %v1414_v53, %v1414_v53 }
 0x601   :  { %v1409_v56 = vpop.f32.mrf.mxu0 }
 0x602   :  { %v1416_v58 = vmul.f32 0.0625, %v1409_v56  ;;  %v1419_v60 = vmul.f32 %v1415_v55, %v1415_v55 }
 0x603   :  { %v1411_v59 = vpop.f32.mrf.mxu0 }
 0x604   :  { %v1420_v61 = vsub.f32 %v1416_v58, %v1418_v57  ;;  %v1417_v62 = vmul.f32 0.0625, %v1411_v59 }
 0x606   :  { %v1422_v63 = vmax.f32 %v1420_v61, 0.0  ;;  %v1421_v0 = vsub.f32 %v1417_v62, %v1419_v60 }
 0x608   :  { %v1424_v1 = vadd.f32 1e-05, %v1422_v63  ;;  %v1423_v38 = vmax.f32 %v1421_v0, 0.0 }
 0x60a   :  { %v1425_v2 = vadd.f32 1e-05, %v1423_v38  ;;  %2092 = vrsqrt.f32 %v1424_v1 }
 0x60c   :  { %2094 = vrsqrt.f32 %v1425_v2 }
 0x617   :  { %v2093_v3 = vpop.eup %2092 }
 0x619   :  { %v2095_v46 = vpop.eup %2094 }
 0x61a   :  { %v1430_v4 = vcombine.low %v2093_v3, %v2095_v46 }
 0x61c   :  { %v1437_v5 = vrot.slane %v1430_v4, %v2333_v6 }
 0x61e   :  { %v1444_v8 = vrot.slane %v1437_v5, %v2333_v6 }
 0x620   :  { %v1446_v9 = vmul.f32 %v1892_v7, %v1444_v8 }
 0x622   :  { %v1451_v10 = vrot.slane %v1446_v9, %v2340_v12  ;;  %v1455_v11 = vrot.slane %v1446_v9, %v2342_v13 }
 0x624   :  { %v1458_v14 = vmul.f32 %v1451_v10, %v1414_v53  ;;  %v1459_v15 = vmul.f32 %v1455_v11, %v1415_v55  ;;  %v1479_v21 = vmul.f32 %v1451_v10, %v1255_v42  ;;  %v1480_v22 = vmul.f32 %v1455_v11, %v1257_v44 }
 0x625   :  { %v1481_v23 = vmul.f32 %v1451_v10, %v1259_v45  ;;  %v1482_v24 = vmul.f32 %v1455_v11, %v1261_v47 }
 0x626   :  { %v1462_v16 = vcombine.low %v1458_v14, %v1459_v15 }
 0x628   :  { %v1469_v17 = vrot.slane %v1462_v16, %v2333_v6 }
 0x62a   :  { %v1476_v19 = vrot.slane %v1469_v17, %v2333_v6 }
 0x62c   :  { %v1478_v20 = vsub.f32 %v1893_v18, %v1476_v19 }
 0x62e   :  { %v1487_v25 = vrot.slane %v1478_v20, %v2340_v12  ;;  %v1491_v26 = vrot.slane %v1478_v20, %v2342_v13 }
 0x630   :  { %v1494_v27 = vadd.f32 %v1487_v25, %v1479_v21  ;;  %v1495_v28 = vadd.f32 %v1491_v26, %v1480_v22  ;;  %v1496_v29 = vadd.f32 %v1487_v25, %v1481_v23  ;;  %v1497_v30 = vadd.f32 %v1491_v26, %v1482_v24 }
 0x632   :  { %v1498_v31 = vmax.f32 %v1494_v27, 0.0  ;;  %v1499_v32 = vmax.f32 %v1495_v28, 0.0  ;;  %v1500_v33 = vmax.f32 %v1496_v29, 0.0  ;;  %v1501_v34 = vmax.f32 %v1497_v30, 0.0 }
 0x634   :  { %v2403_v35 = vpack.c.bf16 %v1500_v33, %v1498_v31  ;;  %v1503_v6 = vpack.c.bf16 %v1501_v34, %v1499_v32 }
 0x635   :  { %2230 = dma.done.wait [#allocation6 + $0x3], 4096 }
 0x636   :  { %2231 = vsyncadd [#allocation6 + $0x3], 4294963200  ;;  %1743 = vmatprep.mubr.bf16.mxu0 %v1503_v6  ;;  %v2096_v36 = vld [vmem:[#allocation5 + $0x74] ss:$8 sps:$4 sm:$0xff]   ;;  %v2098_v37 = vld [vmem:[#allocation5 + $0x70] ss:$8 sps:$4 sm:$0xff]  }
 0x637   :  { %1711 = vmatprep.subr.bf16.mxu0 %v2096_v36  ;;  %v2099_v43 = vld [vmem:[#allocation5 + $0x64] ss:$8 sps:$4 sm:$0xff]   ;;  %v2101_v39 = vld [vmem:[#allocation5 + $0x60] ss:$8 sps:$4 sm:$0xff]   ;;  %v2102_v40 = vld [vmem:[#allocation5 + $0x54] ss:$8 sps:$4 sm:$0xff]  }
 0x638   :  { %1712 = vmatpush1.bf16.msra.mxu0 %v2098_v37  ;;  %v2104_v41 = vld [vmem:[#allocation5 + $0x50] ss:$8 sps:$4 sm:$0xff]   ;;  %v2105_v42 = vld [vmem:[#allocation5 + $0x44] ss:$8 sps:$4 sm:$0xff]   ;;  %v2107_v44 = vld [vmem:[#allocation5 + $0x40] ss:$8 sps:$4 sm:$0xff]  }
 0x639   :  { %1713 = vmatprep.subr.bf16.mxu0 %v2099_v43  ;;  %v2108_v45 = vld [vmem:[#allocation5 + $0x34] ss:$8 sps:$4 sm:$0xff]   ;;  %v2110_v47 = vld [vmem:[#allocation5 + $0x30] ss:$8 sps:$4 sm:$0xff]   ;;  %v2111_v48 = vld [vmem:[#allocation5 + $0x24] ss:$8 sps:$4 sm:$0xff]  }
 0x63a   :  { %v2113_v49 = vld [vmem:[#allocation5 + $0x20] ss:$8 sps:$4 sm:$0xff]   ;;  %v2114_v50 = vld [vmem:[#allocation5 + $0x14] ss:$8 sps:$4 sm:$0xff]   ;;  %v2116_v51 = vld [vmem:[#allocation5 + $0x10] ss:$8 sps:$4 sm:$0xff]  }
 0x63b   :  { %v2117_v52 = vld [vmem:[#allocation5 + $0x4] ss:$8 sps:$4 sm:$0xff]   ;;  %v2119_v53 = vld [vmem:[#allocation5] ss:$8 sps:$4 sm:$0xff]   ;;  %v2120_v54 = vld [vmem:[#allocation5 + $0xf4] ss:$8 sps:$4 sm:$0xff]  }
 0x63c   :  { %1714 = vmatpush1.bf16.msra.mxu0 %v2101_v39  ;;  %v2122_v55 = vld [vmem:[#allocation5 + $0xf0] ss:$8 sps:$4 sm:$0xff]   ;;  %v2123_v56 = vld [vmem:[#allocation5 + $0xe4] ss:$8 sps:$4 sm:$0xff]   ;;  %v2125_v57 = vld [vmem:[#allocation5 + $0xe0] ss:$8 sps:$4 sm:$0xff]  }
 0x63d   :  { %1715 = vmatprep.subr.bf16.mxu0 %v2102_v40  ;;  %v2126_v58 = vld [vmem:[#allocation5 + $0xd4] ss:$8 sps:$4 sm:$0xff]   ;;  %v2128_v59 = vld [vmem:[#allocation5 + $0xd0] ss:$8 sps:$4 sm:$0xff]   ;;  %v2129_v60 = vld [vmem:[#allocation5 + $0xc4] ss:$8 sps:$4 sm:$0xff]  }
 0x63e   :  { %v2131_v61 = vld [vmem:[#allocation5 + $0xc0] ss:$8 sps:$4 sm:$0xff]   ;;  %v2132_v62 = vld [vmem:[#allocation5 + $0xb4] ss:$8 sps:$4 sm:$0xff]   ;;  %v2134_v63 = vld [vmem:[#allocation5 + $0xb0] ss:$8 sps:$4 sm:$0xff]  }
 0x63f   :  { %v2135_v0 = vld [vmem:[#allocation5 + $0xa4] ss:$8 sps:$4 sm:$0xff]   ;;  %v2137_v1 = vld [vmem:[#allocation5 + $0xa0] ss:$8 sps:$4 sm:$0xff]   ;;  %v2138_v38 = vld [vmem:[#allocation5 + $0x94] ss:$8 sps:$4 sm:$0xff]  }
 0x640   :  { %1716 = vmatpush1.bf16.msra.mxu0 %v2104_v41  ;;  %v2140_v2 = vld [vmem:[#allocation5 + $0x90] ss:$8 sps:$4 sm:$0xff]   ;;  %v2141_v3 = vld [vmem:[#allocation5 + $0x84] ss:$8 sps:$4 sm:$0xff]   ;;  %v2143_v46 = vld [vmem:[#allocation5 + $0x80] ss:$8 sps:$4 sm:$0xff]  }
 0x641   :  { %1717 = vmatprep.subr.bf16.mxu0 %v2105_v42  ;;  %v1896_v4 = vld [vmem:[%s2425_s5 + $0x6] ss:$8 sm:$0x3] }
 0x642   :  { %v1544_v5 = vrot.slane %v1896_v4, %v2340_v12  ;;  %v1548_v7 = vrot.slane %v1896_v4, %v2342_v13 }
 0x644   :  { %1718 = vmatpush1.bf16.msra.mxu0 %v2107_v44 }
 0x645   :  { %1719 = vmatprep.subr.bf16.mxu0 %v2108_v45 }
 0x648   :  { %1720 = vmatpush1.bf16.msra.mxu0 %v2110_v47 }
 0x649   :  { %1721 = vmatprep.subr.bf16.mxu0 %v2111_v48 }
 0x64c   :  { %1722 = vmatpush1.bf16.msra.mxu0 %v2113_v49 }
 0x64d   :  { %1723 = vmatprep.subr.bf16.mxu0 %v2114_v50 }
 0x650   :  { %1724 = vmatpush1.bf16.msra.mxu0 %v2116_v51 }
 0x651   :  { %1725 = vmatprep.subr.bf16.mxu0 %v2117_v52 }
 0x654   :  { %1726 = vmatpush1.bf16.msra.mxu0 %v2119_v53 }
 0x655   :  { %1727 = vmatprep.subr.bf16.mxu0 %v2120_v54 }
 0x658   :  { %1728 = vmatpush2.bf16.msra.mxu0 %v2122_v55 }
 0x659   :  { %1729 = vmatprep.subr.bf16.mxu0 %v2123_v56 }
 0x65c   :  { %1730 = vmatpush2.bf16.msra.mxu0 %v2125_v57 }
 0x65d   :  { %1731 = vmatprep.subr.bf16.mxu0 %v2126_v58 }
 0x660   :  { %1732 = vmatpush2.bf16.msra.mxu0 %v2128_v59 }
 0x661   :  { %1733 = vmatprep.subr.bf16.mxu0 %v2129_v60 }
 0x664   :  { %1734 = vmatpush2.bf16.msra.mxu0 %v2131_v61 }
 0x665   :  { %1735 = vmatprep.subr.bf16.mxu0 %v2132_v62 }
 0x668   :  { %1736 = vmatpush2.bf16.msra.mxu0 %v2134_v63 }
 0x669   :  { %1737 = vmatprep.subr.bf16.mxu0 %v2135_v0 }
 0x66c   :  { %1738 = vmatpush2.bf16.msra.mxu0 %v2137_v1 }
 0x66d   :  { %1739 = vmatprep.subr.bf16.mxu0 %v2138_v38 }
 0x670   :  { %1740 = vmatpush2.bf16.msra.mxu0 %v2140_v2 }
 0x671   :  { %1741 = vmatprep.subr.bf16.mxu0 %v2141_v3 }
 0x674   :  { %1742 = vmatpush2.bf16.msra.mxu0 %v2143_v46 }
 0x677   :  { %1744 = vmatmul.mubr.bf16.vlgmr.msra.gmra.mxu0 %v2403_v35 }
 0x737   :  { %v1745_v8 = vpop.f32.mrf.mxu0 }
 0x738   :  { %v1746_v9 = vadd.f32 %v1745_v8, %v1544_v5 }
 0x739   :  { %v1747_v10 = vpop.f32.mrf.mxu0 }
 0x73a   :  { %1754 = vst [vmem:[%s2426_s6] sm:$0xff] %v1746_v9  ;;  %v1748_v11 = vadd.f32 %v1747_v10, %v1548_v7 }
 0x73b   :  { %v1749_v14 = vpop.f32.mrf.mxu0 }
 0x73c   :  { %1755 = vst [vmem:[%s2426_s6 + $0x8] sm:$0xff] %v1748_v11  ;;  %v1750_v15 = vadd.f32 %v1749_v14, %v1544_v5 }
 0x73d   :  { %v1751_v16 = vpop.f32.mrf.mxu0 }
 0x73e   :  { %1756 = vst [vmem:[%s2426_s6 + $0x10] sm:$0xff] %v1750_v15  ;;  %v1752_v12 = vadd.f32 %v1751_v16, %v1548_v7 }
 0x740   :  { %1757 = vst [vmem:[%s2426_s6 + $0x18] sm:$0xff] %v1752_v12 }
 0x741   :  { %1762 = vsyncmov [#allocation6] }
 0x744   :  { %s1763_s16 = vpop.sfrf %1762 }
 0x745   :  { %p1929_p6 = scmp.ne.s32.totalorder %s1763_s16, 0 }
 0x747   :  { %1767 = shalt.err (%p1929_p6)  }
 0x748   :  { %1769 = vsyncmov [#allocation6 + $0x1] }
 0x74b   :  { %s1770_s17 = vpop.sfrf %1769 }
 0x74c   :  { %p1930_p7 = scmp.ne.s32.totalorder %s1770_s17, 0 }
 0x74e   :  { %1774 = shalt.err (%p1930_p7)  }
 0x74f   :  { %1776 = vsyncmov [#allocation6 + $0x2] }
 0x752   :  { %s1777_s18 = vpop.sfrf %1776 }
 0x753   :  { %p1931_p8 = scmp.ne.s32.totalorder %s1777_s18, 0 }
 0x755   :  { %1781 = shalt.err (%p1931_p8)  }
 0x756   :  { %1783 = vsyncmov [#allocation6 + $0x3] }
 0x759   :  { %s1784_s1 = vpop.sfrf %1783 }
 0x75a   :  { %p1932_p9 = scmp.ne.s32.totalorder %s1784_s1, 0 }
 0x75c   :  { %1788 = shalt.err (%p1932_p9)  }

</bundles_post_ra>
